<compile_context>
chip_gen: v6e
topology: v6e:2x2x1
jax: 0.10.0
libtpu: 0.0.40
codegen_flags: <defaults>
</compile_context>

<pallas_src>
import jax
import jax.numpy as jnp
from jax.experimental import pallas as pl
from jax.experimental.pallas import tpu as pltpu

H1 = 256
H2 = 128
OUT = 2
OUT_T = 8              # output rows padded to one sublane group (2 real + 6 zero)
LEAKY_SLOPE = 0.01     # torch.nn.functional.leaky_relu default negative_slope


def _round_up(x, m):
    return (x + m - 1) // m * m


def _leaky_relu(x):
    return jnp.where(x > 0, x, LEAKY_SLOPE * x)


def graphing_kernel(x_ref, w1_ref, b1_ref, w2_ref, b2_ref, w3t_ref, b3t_ref,
                    o_ref, acc_ref):
    """Grid = (batch blocks, genome-reduction blocks). acc_ref: layer-1 pre-act."""
    k = pl.program_id(1)

    @pl.when(k == 0)
    def _():
        acc_ref[...] = jnp.zeros_like(acc_ref)

    # x arrives in its HBM dtype (f32); cast on the VPU in VMEM. Layer-1 partial
    # matmul accumulates in f32 across the genome (k) axis.
    xv = x_ref[...].astype(w1_ref.dtype)
    acc_ref[...] += jnp.dot(xv, w1_ref[...], preferred_element_type=jnp.float32)

    @pl.when(k == pl.num_programs(1) - 1)
    def _():
        h = _leaky_relu(acc_ref[...] + b1_ref[...])
        h = jnp.dot(h.astype(w2_ref.dtype), w2_ref[...],
                    preferred_element_type=jnp.float32)
        h = _leaky_relu(h + b2_ref[...])
        # Output layer computed transposed (gamma already folded into w3t/b3t):
        # (OUT_T, H2) contracted with (block_b, H2) on H2 -> (OUT_T, block_b),
        # i.e. lane-dense along the batch dim; only 2 of the 8 rows are real.
        yt = jax.lax.dot_general(
            w3t_ref[...], h.astype(w3t_ref.dtype),
            dimension_numbers=(((1,), (1,)), ((), ())),
            preferred_element_type=jnp.float32)
        o_ref[...] = (yt + b3t_ref[...]).astype(o_ref.dtype)


def prepare_params(params, genome_size, compute_dtype=jnp.bfloat16):
    """Pad / fold / cast raw (PyTorch-layout) params for the kernel.

    - W1 zero-padded along the input dim to a multiple of 128 lanes.
    - gamma folded into the output layer; W3/b3 stored transposed and zero-padded
      to OUT_T rows so the kernel emits a lane-dense (OUT_T, block_b) tile.
    - weights cast to compute_dtype (bf16 by default); biases kept in f32.
    """
    w1, b1, w2, b2, w3, b3, gamma = params
    g_pad = _round_up(genome_size, 128)
    gamma = jnp.asarray(gamma, jnp.float32).reshape(())
    w1p = jnp.zeros((g_pad, H1), jnp.float32).at[:genome_size, :].set(w1)
    w3t = jnp.zeros((OUT_T, H2), jnp.float32).at[:OUT, :].set(
        (jnp.asarray(w3, jnp.float32) * gamma).T)
    b3t = jnp.zeros((OUT_T, 1), jnp.float32).at[:OUT, :].set(
        jnp.asarray(b3, jnp.float32).reshape(OUT, 1) * gamma)
    return (w1p.astype(compute_dtype),
            jnp.asarray(b1, jnp.float32).reshape(1, H1),
            jnp.asarray(w2, compute_dtype),
            jnp.asarray(b2, jnp.float32).reshape(1, H2),
            w3t.astype(compute_dtype),
            b3t)


def _vmem_capacity_bytes():
    try:
        return int(pltpu.get_tpu_info().vmem_capacity_bytes)
    except Exception:
        return 64 * 1024 * 1024       # conservative fallback: v7x physical VMEM


def _choose_blocks(B, g_pad, x_itemsize, w_itemsize, vmem_cap):
    """Pick (block_b, block_k) from batch size, genome width and VMEM capacity."""
    budget = min(32 << 20, max(8 << 20, vmem_cap // 4))   # 32 MiB v5e/v6e, 16 MiB v7x
    row_cap = 4096 if vmem_cap >= (96 << 20) else 2048

    block_k = min(g_pad, 2048)

    if B <= 128:
        return _round_up(B, 8), block_k      # single batch tile / grid step

    # Batch-dependent VMEM per row: double-buffered f32 x tile, its compute-dtype
    # copy, f32/bf16 intermediates, the layer-1 accumulator and the output tile.
    per_row = (2 * block_k * x_itemsize + block_k * w_itemsize
               + 4 * (H1 + H2) * 4 + (H1 + H2) * w_itemsize
               + H1 * 4 + 2 * OUT_T * 4)
    fixed = (2 * block_k * H1 * w_itemsize + 2 * H1 * H2 * w_itemsize) + (1 << 20)
    avail = max(budget - fixed, 2 << 20)
    fit = max(128, (avail // per_row) // 128 * 128)
    want = max(128, _round_up(pl.cdiv(B, 8), 128))   # aim for >= ~8 grid steps
    return int(min(fit, want, row_cap)), block_k


def graphing_model_forward(x, prepped, *, block_b=None, block_k=None):
    """Fused MLP forward. x: (B, genome_size) float -> (B, 2) float32."""
    w1, b1, w2, b2, w3t, b3t = prepped
    B, G = x.shape
    g_pad, h1 = w1.shape
    assert h1 == H1 and G <= g_pad
    compute_dtype = w1.dtype
    w_itemsize = jnp.dtype(compute_dtype).itemsize
    x_itemsize = jnp.dtype(x.dtype).itemsize
    vmem_cap = _vmem_capacity_bytes()

    auto_b, auto_k = _choose_blocks(B, g_pad, x_itemsize, w_itemsize, vmem_cap)
    block_b = auto_b if block_b is None else block_b
    block_k = auto_k if block_k is None else block_k
    assert block_b % 8 == 0, "block_b must be a multiple of 8 (f32 sublane)"
    assert block_k % 128 == 0 and g_pad % block_k == 0

    b_pad = _round_up(B, block_b)
    if b_pad // block_b > 1:
        assert block_b % 128 == 0, "tiled batch blocks must be lane-aligned"

    xp = x
    if (b_pad, g_pad) != (B, G):        # pad only the ragged case (no extra pass otherwise)
        xp = jnp.pad(x, ((0, b_pad - B), (0, g_pad - G)))

    grid = (b_pad // block_b, g_pad // block_k)

    weight_bytes = sum(int(a.size) * a.dtype.itemsize for a in prepped)
    cost = pl.CostEstimate(
        flops=2 * b_pad * (g_pad * H1 + H1 * H2 + H2 * OUT_T),
        transcendentals=0,
        bytes_accessed=int(b_pad * g_pad * x_itemsize + weight_bytes
                           + OUT_T * b_pad * 4),
    )

    # Rough VMEM need (double-buffered tiles + resident weights + in-kernel values),
    # with 4x slack; capped at 85% of physical VMEM so the compiler keeps headroom.
    est = (2 * block_b * block_k * x_itemsize
           + 2 * block_k * H1 * w_itemsize
           + 2 * (H1 * H2 + OUT_T * H2) * w_itemsize
           + 2 * (H1 + H2 + OUT_T) * 4
           + 2 * OUT_T * block_b * 4
           + block_b * H1 * 4
           + block_b * (block_k * w_itemsize + 4 * (H1 + H2) * 4
                        + (H1 + H2) * w_itemsize))
    vmem_limit = int(min(int(vmem_cap * 0.85), max(4 * est, 32 << 20)))

    out = pl.pallas_call(
        graphing_kernel,
        out_shape=jax.ShapeDtypeStruct((OUT_T, b_pad), jnp.float32),
        grid_spec=pltpu.PrefetchScalarGridSpec(
            num_scalar_prefetch=0,
            grid=grid,
            in_specs=[
                pl.BlockSpec((block_b, block_k), lambda i, k: (i, k)),  # x tile (f32)
                pl.BlockSpec((block_k, H1), lambda i, k: (k, 0)),       # W1 slab
                pl.BlockSpec((1, H1), lambda i, k: (0, 0)),             # b1
                pl.BlockSpec((H1, H2), lambda i, k: (0, 0)),            # W2
                pl.BlockSpec((1, H2), lambda i, k: (0, 0)),             # b2
                pl.BlockSpec((OUT_T, H2), lambda i, k: (0, 0)),         # W3^T (gamma folded)
                pl.BlockSpec((OUT_T, 1), lambda i, k: (0, 0)),          # b3^T
            ],
            out_specs=pl.BlockSpec((OUT_T, block_b), lambda i, k: (0, i)),
            scratch_shapes=[pltpu.VMEM((block_b, H1), jnp.float32)],
        ),
        compiler_params=pltpu.CompilerParams(
            dimension_semantics=("parallel", "arbitrary"),
            vmem_limit_bytes=vmem_limit),
        cost_estimate=cost,
    )(xp, w1, b1, w2, b2, w3t, b3t)

    return out[:OUT, :B].T


def init_params(key, genome_size):
    """PyTorch nn.Linear default init: U(-1/sqrt(fan_in), +1/sqrt(fan_in))."""
    def linear(k, fan_in, fan_out):
        kw, kb = jax.random.split(k)
        bound = 1.0 / jnp.sqrt(fan_in)
        w = jax.random.uniform(kw, (fan_in, fan_out), jnp.float32, -bound, bound)
        b = jax.random.uniform(kb, (1, fan_out), jnp.float32, -bound, bound)
        return w, b

    k1, k2, k3 = jax.random.split(key, 3)
    w1, b1 = linear(k1, genome_size, H1)
    w2, b2 = linear(k2, H1, H2)
    w3, b3 = linear(k3, H2, OUT)
    gamma = jnp.array(1.0, dtype=jnp.float32)   # nn.Parameter(torch.tensor(1.0))
    return (w1, b1, w2, b2, w3, b3, gamma)


def reference_forward(x, params):
    w1, b1, w2, b2, w3, b3, gamma = params
    hp = jax.lax.Precision.HIGHEST
    h = _leaky_relu(jnp.dot(x, w1, precision=hp) + b1)
    h = _leaky_relu(jnp.dot(h, w2, precision=hp) + b2)
    return (jnp.dot(h, w3, precision=hp) + b3) * gamma


def _check(out, ref, tol, name):
    scale = float(jnp.max(jnp.abs(ref))) + 1e-6
    err = float(jnp.max(jnp.abs(out - ref))) / scale
    assert err < tol, f"{name}: relative error {err}"


# TODO(synk): calc_gamma / save / load are training & IO utilities, not part of the
# forward pass; gamma is consumed by folding it into the output layer at prep time.

if __name__ == "__main__":
    genome_size = 32
    batch = 8

    key = jax.random.PRNGKey(0)
    kx, kp = jax.random.split(key)
    x = jax.random.normal(kx, (batch, genome_size), dtype=jnp.float32)
    params = init_params(kp, genome_size)
    # non-trivial gamma to exercise the fold-into-W3/b3 path
    params = params[:-1] + (jnp.array(1.37, dtype=jnp.float32),)
    ref = reference_forward(x, params)

    # f32 matmul path: tight-tolerance correctness check.
    prepped_f32 = prepare_params(params, genome_size, compute_dtype=jnp.float32)
    out_f32 = jax.block_until_ready(graphing_model_forward(x, prepped_f32))
    assert out_f32.shape == (batch, OUT)
    _check(out_f32, ref, 2e-3, "f32 path")

    # bf16 matmul path (default / fast on v6e & v7x): looser, scale-aware tolerance.
    prepped_bf16 = prepare_params(params, genome_size)
    out_bf16 = jax.block_until_ready(graphing_model_forward(x, prepped_bf16))
    _check(out_bf16, ref, 3e-2, "bf16 path")

    # Non-multiple-of-8 batch exercises the batch-padding path.
    x2 = jax.random.normal(jax.random.PRNGKey(1), (20, genome_size), dtype=jnp.float32)
    out2 = jax.block_until_ready(graphing_model_forward(x2, prepped_f32))
    _check(out2, reference_forward(x2, params), 2e-3, "ragged batch")

    # Multi-step genome-reduction axis (g_pad=384, block_k=128 -> 3 accumulate steps).
    g2, b2_ = 300, 24
    params2 = init_params(jax.random.PRNGKey(2), g2)
    x3 = jax.random.normal(jax.random.PRNGKey(3), (b2_, g2), dtype=jnp.float32)
    prepped2 = prepare_params(params2, g2, compute_dtype=jnp.float32)
    out3 = jax.block_until_ready(graphing_model_forward(x3, prepped2, block_k=128))
    _check(out3, reference_forward(x3, params2), 2e-3, "k-tiled path")

    print("KERNEL_OK")
</pallas_src>

<mosaic_0001>
module attributes {stable_mosaic.version = 11 : i64} {
  func.func @graphing_kernel(%arg0: i32, %arg1: i32, %arg2: memref<8x128xf32, #tpu.memory_space<vmem>>, %arg3: memref<128x256xf32, #tpu.memory_space<vmem>>, %arg4: memref<1x256xf32, #tpu.memory_space<vmem>>, %arg5: memref<256x128xf32, #tpu.memory_space<vmem>>, %arg6: memref<1x128xf32, #tpu.memory_space<vmem>>, %arg7: memref<8x128xf32, #tpu.memory_space<vmem>>, %arg8: memref<8x1xf32, #tpu.memory_space<vmem>>, %arg9: memref<8x8xf32, #tpu.memory_space<vmem>>, %arg10: memref<8x256xf32, #tpu.memory_space<vmem>>) attributes {dimension_semantics = [#tpu.dimension_semantics<parallel>, #tpu.dimension_semantics<arbitrary>], iteration_bounds = array<i64: 1, 1>, scalar_prefetch = 0 : i64, scratch_operands = 1 : i64, tpu.core_type = #tpu.core_type<tc>, window_params = [{transform_indices = @transform_0, window_bounds = array<i64: 8, 128>}, {transform_indices = @transform_1, window_bounds = array<i64: 128, 256>}, {pipeline_mode = #tpu.pipeline_mode<synchronous>, transform_indices = @transform_2, window_bounds = array<i64: 1, 256>}, {pipeline_mode = #tpu.pipeline_mode<synchronous>, transform_indices = @transform_3, window_bounds = array<i64: 256, 128>}, {pipeline_mode = #tpu.pipeline_mode<synchronous>, transform_indices = @transform_4, window_bounds = array<i64: 1, 128>}, {pipeline_mode = #tpu.pipeline_mode<synchronous>, transform_indices = @transform_5, window_bounds = array<i64: 8, 128>}, {pipeline_mode = #tpu.pipeline_mode<synchronous>, transform_indices = @transform_6, window_bounds = array<i64: 8, 1>}, {transform_indices = @transform_7, window_bounds = array<i64: 8, 8>}]} {
    %c0_i32 = arith.constant 0 : i32
    %0 = arith.cmpi eq, %arg1, %c0_i32 : i32
    %1 = arith.extui %0 : i1 to i32
    %c0_i32_0 = arith.constant 0 : i32
    %2 = arith.cmpi ne, %1, %c0_i32_0 : i32
    scf.if %2 {
      %cst_10 = arith.constant 0.000000e+00 : f32
      %12 = vector.broadcast %cst_10 : f32 to vector<8x256xf32>
      %c0_11 = arith.constant 0 : index
      %c0_12 = arith.constant 0 : index
      %13 = vector.load %arg10[%c0_11, %c0_12] : memref<8x256xf32, #tpu.memory_space<vmem>>, vector<8x256xf32>
      tpu.vector_store %arg10[%c0_11, %c0_12], %12 {strides = array<i32>} : memref<8x256xf32, #tpu.memory_space<vmem>>, vector<8x256xf32>,
    } else {
    }
    %c0 = arith.constant 0 : index
    %c0_1 = arith.constant 0 : index
    %3 = vector.load %arg2[%c0, %c0_1] : memref<8x128xf32, #tpu.memory_space<vmem>>, vector<8x128xf32>
    %c0_2 = arith.constant 0 : index
    %c0_3 = arith.constant 0 : index
    %4 = vector.load %arg10[%c0_2, %c0_3] : memref<8x256xf32, #tpu.memory_space<vmem>>, vector<8x256xf32>
    %c0_4 = arith.constant 0 : index
    %c0_5 = arith.constant 0 : index
    %5 = vector.load %arg3[%c0_4, %c0_5] : memref<128x256xf32, #tpu.memory_space<vmem>>, vector<128x256xf32>
    %cst = arith.constant dense<0.000000e+00> : vector<8x256xf32>
    %6 = tpu.matmul %3, %5, %cst {dimension_numbers = #tpu.dot_dimension_numbers<[1], [0], [0], [1], [0, 0, 1, 1], [], []>} : vector<8x128xf32>, vector<128x256xf32>, vector<8x256xf32> -> vector<8x256xf32>
    %7 = arith.addf %4, %6 : vector<8x256xf32>
    %c0_6 = arith.constant 0 : index
    %c0_7 = arith.constant 0 : index
    %8 = vector.load %arg10[%c0_6, %c0_7] : memref<8x256xf32, #tpu.memory_space<vmem>>, vector<8x256xf32>
    tpu.vector_store %arg10[%c0_6, %c0_7], %7 {strides = array<i32>} : memref<8x256xf32, #tpu.memory_space<vmem>>, vector<8x256xf32>,
    %c0_i32_8 = arith.constant 0 : i32
    %9 = arith.cmpi eq, %arg1, %c0_i32_8 : i32
    %10 = arith.extui %9 : i1 to i32
    %c0_i32_9 = arith.constant 0 : i32
    %11 = arith.cmpi ne, %10, %c0_i32_9 : i32
    scf.if %11 {
      %c0_10 = arith.constant 0 : index
      %c0_11 = arith.constant 0 : index
      %12 = vector.load %arg10[%c0_10, %c0_11] : memref<8x256xf32, #tpu.memory_space<vmem>>, vector<8x256xf32>
      %c0_12 = arith.constant 0 : index
      %c0_13 = arith.constant 0 : index
      %13 = vector.load %arg4[%c0_12, %c0_13] : memref<1x256xf32, #tpu.memory_space<vmem>>, vector<1x256xf32>
      %14 = vector.broadcast %13 : vector<1x256xf32> to vector<8x256xf32>
      %15 = arith.addf %12, %14 : vector<8x256xf32>
      %cst_14 = arith.constant 0.000000e+00 : f32
      %16 = vector.broadcast %cst_14 : f32 to vector<8x256xf32>
      %17 = arith.cmpf ogt, %15, %16 : vector<8x256xf32>
      %cst_15 = arith.constant 0.00999999977 : f32
      %18 = vector.broadcast %cst_15 : f32 to vector<8x256xf32>
      %19 = arith.mulf %18, %15 : vector<8x256xf32>
      %20 = arith.select %17, %15, %19 : vector<8x256xi1>, vector<8x256xf32>
      %c0_16 = arith.constant 0 : index
      %c0_17 = arith.constant 0 : index
      %21 = vector.load %arg5[%c0_16, %c0_17] : memref<256x128xf32, #tpu.memory_space<vmem>>, vector<256x128xf32>
      %cst_18 = arith.constant dense<0.000000e+00> : vector<8x128xf32>
      %22 = tpu.matmul %20, %21, %cst_18 {dimension_numbers = #tpu.dot_dimension_numbers<[1], [0], [0], [1], [0, 0, 1, 1], [], []>} : vector<8x256xf32>, vector<256x128xf32>, vector<8x128xf32> -> vector<8x128xf32>
      %c0_19 = arith.constant 0 : index
      %c0_20 = arith.constant 0 : index
      %23 = vector.load %arg6[%c0_19, %c0_20] : memref<1x128xf32, #tpu.memory_space<vmem>>, vector<1x128xf32>
      %24 = vector.broadcast %23 : vector<1x128xf32> to vector<8x128xf32>
      %25 = arith.addf %22, %24 : vector<8x128xf32>
      %cst_21 = arith.constant 0.000000e+00 : f32
      %26 = vector.broadcast %cst_21 : f32 to vector<8x128xf32>
      %27 = arith.cmpf ogt, %25, %26 : vector<8x128xf32>
      %cst_22 = arith.constant 0.00999999977 : f32
      %28 = vector.broadcast %cst_22 : f32 to vector<8x128xf32>
      %29 = arith.mulf %28, %25 : vector<8x128xf32>
      %30 = arith.select %27, %25, %29 : vector<8x128xi1>, vector<8x128xf32>
      %c0_23 = arith.constant 0 : index
      %c0_24 = arith.constant 0 : index
      %31 = vector.load %arg7[%c0_23, %c0_24] : memref<8x128xf32, #tpu.memory_space<vmem>>, vector<8x128xf32>
      %cst_25 = arith.constant dense<0.000000e+00> : vector<8x8xf32>
      %32 = tpu.matmul %31, %30, %cst_25 {dimension_numbers = #tpu.dot_dimension_numbers<[1], [1], [0], [0], [0, 0, 1, 0], [], []>} : vector<8x128xf32>, vector<8x128xf32>, vector<8x8xf32> -> vector<8x8xf32>
      %c0_26 = arith.constant 0 : index
      %c0_27 = arith.constant 0 : index
      %33 = vector.load %arg8[%c0_26, %c0_27] : memref<8x1xf32, #tpu.memory_space<vmem>>, vector<8x1xf32>
      %34 = vector.broadcast %33 : vector<8x1xf32> to vector<8x8xf32>
      %35 = arith.addf %32, %34 : vector<8x8xf32>
      %c0_28 = arith.constant 0 : index
      %c0_29 = arith.constant 0 : index
      %36 = vector.load %arg9[%c0_28, %c0_29] : memref<8x8xf32, #tpu.memory_space<vmem>>, vector<8x8xf32>
      tpu.vector_store %arg9[%c0_28, %c0_29], %35 {strides = array<i32>} : memref<8x8xf32, #tpu.memory_space<vmem>>, vector<8x8xf32>,
    } else {
    }
    return
  }
  func.func @transform_0(%arg0: i32, %arg1: i32) -> (i32, i32) {
    %c0_i32 = arith.constant 0 : i32
    return %arg0, %arg1 : i32, i32
  }
  func.func @transform_1(%arg0: i32, %arg1: i32) -> (i32, i32) {
    %c0_i32 = arith.constant 0 : i32
    %c0_i32_0 = arith.constant 0 : i32
    return %arg1, %c0_i32 : i32, i32
  }
  func.func @transform_2(%arg0: i32, %arg1: i32) -> (i32, i32) {
    %c0_i32 = arith.constant 0 : i32
    %c0_i32_0 = arith.constant 0 : i32
    %c0_i32_1 = arith.constant 0 : i32
    return %c0_i32, %c0_i32_0 : i32, i32
  }
  func.func @transform_3(%arg0: i32, %arg1: i32) -> (i32, i32) {
    %c0_i32 = arith.constant 0 : i32
    %c0_i32_0 = arith.constant 0 : i32
    %c0_i32_1 = arith.constant 0 : i32
    return %c0_i32, %c0_i32_0 : i32, i32
  }
  func.func @transform_4(%arg0: i32, %arg1: i32) -> (i32, i32) {
    %c0_i32 = arith.constant 0 : i32
    %c0_i32_0 = arith.constant 0 : i32
    %c0_i32_1 = arith.constant 0 : i32
    return %c0_i32, %c0_i32_0 : i32, i32
  }
  func.func @transform_5(%arg0: i32, %arg1: i32) -> (i32, i32) {
    %c0_i32 = arith.constant 0 : i32
    %c0_i32_0 = arith.constant 0 : i32
    %c0_i32_1 = arith.constant 0 : i32
    return %c0_i32, %c0_i32_0 : i32, i32
  }
  func.func @transform_6(%arg0: i32, %arg1: i32) -> (i32, i32) {
    %c0_i32 = arith.constant 0 : i32
    %c0_i32_0 = arith.constant 0 : i32
    %c0_i32_1 = arith.constant 0 : i32
    return %c0_i32, %c0_i32_0 : i32, i32
  }
  func.func @transform_7(%arg0: i32, %arg1: i32) -> (i32, i32) {
    %c0_i32 = arith.constant 0 : i32
    %c0_i32_0 = arith.constant 0 : i32
    return %c0_i32, %arg0 : i32, i32
  }
}

</mosaic_0001>

<bundles_post_ra>
// kernel: tpu_custom_call.1
= control target key start
LH: loop header
LB: loop body
LE: loop exit
PB: predicated region body
PF: predicated region fallthrough
CT: control target
= control target key end

     0   :  { %12 = vsyncpa [#allocation4], 0  ;;  %s670_s0 = inlined_call_operand.vmem [shape: f32[8,128], index: 0, kind: input, shape index: {}]   ;;  %s671_s1 = inlined_call_operand.hbm [shape: f32[128,256], index: 1, kind: input, shape index: {}]   ;;  %s672_s2 = inlined_call_operand.hbm [shape: f32[1,256], index: 2, kind: input, shape index: {}]   ;;  %s673_s3 = inlined_call_operand.hbm [shape: f32[256,128], index: 3, kind: input, shape index: {}]   ;;  %s674_s4 = inlined_call_operand.hbm [shape: f32[1,128], index: 4, kind: input, shape index: {}]   ;;  %s675_s5 = inlined_call_operand.vmem [shape: f32[8,128], index: 5, kind: input, shape index: {}]   ;;  %s676_s6 = inlined_call_operand.vmem [shape: f32[8,1], index: 6, kind: input, shape index: {}]   ;;  %s677_s7 = inlined_call_operand.hbm [shape: f32[8,8], index: 7, kind: output, shape index: {}]  }
   0x1   :  { %13 = vsyncpa [#allocation7], 0 }
   0x2   :  { %14 = vsyncpa [#allocation10], 0 }
   0x3   :  { %15 = vsyncpa [#allocation5], 0  ;;  %s591_s24 = smov [#allocation6]   ;;  %s592_s26 = smov [#allocation3]  }
   0x4   :  { %s36_s25 = sshll.u32 %s591_s24, 4  ;;  %s23_s27 = sshll.u32 %s592_s26, 4  ;;  %s37_s25 = int_to_ptr.vmem [resolvable:$true] %s36_s25  ;;  %s24_s27 = int_to_ptr.vmem [resolvable:$true] %s23_s27 }
   0x5   :  { %s491_s28 = scalar_lea.vmem %s37_s25, 32  ;;  %p496_p1 = scmp.lt.s32.totalorder %s37_s25, %s37_s25 }
   0x6   :  { %p492_p0 = scmp.ne.s32.totalorder %s37_s25, %s491_s28  ;;  %p497_p2 = scmp.lt.s32.totalorder %s491_s28, %s491_s28 }
   0x8   :  { %p498_p3 = por %p497_p2, %p496_p1 }
   0xa   :  { %p499_p4 = pnand %p498_p3, %p492_p0 }
   0xc   :  { %502 = shalt.err (!%p499_p4)
}
   0xd   :  { %39 = dma.hbm_to_vmem [thread:$0]  %s672_s2, 32, %s37_s25, [#allocation7]  }
   0xe   :  { %s511_s8 = scalar_lea.vmem %s24_s27, 4096  ;;  %p516_p6 = scmp.lt.s32.totalorder %s24_s27, %s24_s27 }
   0xf   :  { %p512_p5 = scmp.ne.s32.totalorder %s24_s27, %s511_s8  ;;  %p517_p7 = scmp.lt.s32.totalorder %s511_s8, %s511_s8 }
  0x11   :  { %p518_p8 = por %p517_p7, %p516_p6 }
  0x13   :  { %p519_p9 = pnand %p518_p8, %p512_p5 }
  0x15   :  { %522 = shalt.err (!%p519_p9)
}
  0x16   :  { %s593_s9 = smov 256   ;;  %s594_s10 = smov 16  }
  0x17   :  { %29 = dma.hbm_to_vmem [thread:$0]  %s671_s1, 4096, %s24_s27, [#allocation4], %s593_s9, %s593_s9, %s594_s10  }
  0x18   :  { %s595_s13 = smov [#allocation8]  }
  0x19   :  { %s45_s14 = sshll.u32 %s595_s13, 4  ;;  %s46_s14 = int_to_ptr.vmem [resolvable:$true] %s45_s14 }
  0x1a   :  { %s531_s15 = scalar_lea.vmem %s46_s14, 4096  ;;  %p536_p11 = scmp.lt.s32.totalorder %s46_s14, %s46_s14 }
  0x1b   :  { %p532_p10 = scmp.ne.s32.totalorder %s46_s14, %s531_s15  ;;  %p537_p12 = scmp.lt.s32.totalorder %s531_s15, %s531_s15 }
  0x1d   :  { %p538_p13 = por %p537_p12, %p536_p11 }
  0x1f   :  { %p539_p0 = pnand %p538_p13, %p532_p10 }
  0x21   :  { %542 = shalt.err (!%p539_p0)
}
  0x22   :  { %s596_s2 = smov 128   ;;  %s597_s16 = smov 8  }
  0x23   :  { %51 = dma.hbm_to_vmem [thread:$0]  %s673_s3, 4096, %s46_s14, [#allocation7], %s596_s2, %s596_s2, %s597_s16  }
  0x24   :  { %s598_s19 = smov [#allocation9]  }
  0x25   :  { %s58_s20 = sshll.u32 %s598_s19, 4  ;;  %s59_s20 = int_to_ptr.vmem [resolvable:$true] %s58_s20 }
  0x26   :  { %s551_s1 = scalar_lea.vmem %s59_s20, 16  ;;  %s555_s21 = scalar_lea.vmem %s59_s20, 32 }
  0x27   :  { %p552_p1 = scmp.ne.s32.totalorder %s59_s20, %s551_s1  ;;  %p556_p2 = scmp.lt.s32.totalorder %s59_s20, %s59_s20 }
  0x28   :  { %p557_p3 = scmp.lt.s32.totalorder %s555_s21, %s551_s1 }
  0x2a   :  { %p558_p4 = por %p557_p3, %p556_p2 }
  0x2c   :  { %p559_p5 = pnand %p558_p4, %p552_p1 }
  0x2e   :  { %562 = shalt.err (!%p559_p5)
}
  0x2f   :  { %61 = dma.hbm_to_vmem [thread:$0]  %s674_s4, 16, %s59_s20, [#allocation10]  }
  0x30   :  { %583 = dma.done.wait [#allocation4], 4096  }
  0x31   :  { %584 = vsyncadd [#allocation4], 4294963200 }
  0x32   :  { %585 = dma.done.wait [#allocation7], 4128  }
  0x33   :  { %586 = vsyncadd [#allocation7], 4294963168 }
  0x34   :  { %587 = dma.done.wait [#allocation10], 16  }
  0x35   :  { %588 = vsyncadd [#allocation10], 4294967280  ;;  %v599_v0 = vmov 0.0   ;;  %v118_v1 = vld [vmem:[#allocation3 + $0xf8] sm:$0xff]  ;;  %v117_v2 = vld [vmem:[#allocation3 + $0xf0] sm:$0xff]  ;;  %vm600_vm2 = vmmov 0  }
  0x36   :  { %183 = vmatprep.mubr.f32.mxu0 %v599_v0  ;;  %v116_v3 = vld [vmem:[#allocation3 + $0xe8] sm:$0xff]  ;;  %119 = vmatprep.subr.mxu0 %v118_v1  ;;  %v115_v4 = vld [vmem:[#allocation3 + $0xe0] sm:$0xff]  ;;  %v114_v5 = vld [vmem:[#allocation3 + $0xd8] sm:$0xff]  ;;  %s602_s27 = smov [#allocation11]   ;;  %vm408_vm4 = vcmask 64512  }
  0x37   :  { %120 = vmatpush1.msra.mxu0 %v117_v2  ;;  %v113_v6 = vld [vmem:[#allocation3 + $0xd0] sm:$0xff]  ;;  %v112_v7 = vld [vmem:[#allocation3 + $0xc8] sm:$0xff]  ;;  %v111_v8 = vld [vmem:[#allocation3 + $0xc0] sm:$0xff] }
  0x38   :  { %121 = vmatprep.subr.mxu0 %v116_v3  ;;  %v110_v9 = vld [vmem:[#allocation3 + $0xb8] sm:$0xff]  ;;  %v109_v10 = vld [vmem:[#allocation3 + $0xb0] sm:$0xff]  ;;  %v108_v11 = vld [vmem:[#allocation3 + $0xa8] sm:$0xff]  ;;  %v201_v3 = vlaneseq }
  0x39   :  { %122 = vmatpush1.msra.mxu0 %v115_v4  ;;  %v107_v12 = vld [vmem:[#allocation3 + $0xa0] sm:$0xff]  ;;  %v106_v13 = vld [vmem:[#allocation3 + $0x98] sm:$0xff]  ;;  %v105_v14 = vld [vmem:[#allocation3 + $0x90] sm:$0xff] }
  0x3a   :  { %123 = vmatprep.subr.mxu0 %v114_v5  ;;  %v250_v15 = vld [vmem:[#allocation8 + $0xf8] sm:$0xff]  ;;  %v249_v17 = vld [vmem:[#allocation8 + $0xf0] sm:$0xff]  ;;  %v104_v18 = vld [vmem:[#allocation3 + $0x88] sm:$0xff]  ;;  %v202_v4 = vshrl.u32 %v201_v3, 7 }
  0x3b   :  { %124 = vmatpush1.msra.mxu0 %v113_v6  ;;  %v234_v16 = vld [vmem:[#allocation8 + $0x78] sm:$0xff]  ;;  %428 = vmatprep.subr.mxu1 %v250_v15  ;;  %v233_v19 = vld [vmem:[#allocation8 + $0x70] sm:$0xff]  ;;  %v248_v21 = vld [vmem:[#allocation8 + $0xe8] sm:$0xff] }
  0x3c   :  { %125 = vmatprep.subr.mxu0 %v112_v7  ;;  %v103_v20 = vld [vmem:[#allocation3 + $0x80] sm:$0xff]  ;;  %429 = vmatpush3.msra.mxu1 %v234_v16  ;;  %v102_v22 = vld [vmem:[#allocation3 + $0x78] sm:$0xff]  ;;  %v232_v23 = vld [vmem:[#allocation8 + $0x68] sm:$0xff]  ;;  %v203_v5 = vsub.s32 0, %v202_v4  ;;  %v207_v7 = vsub.s32 1, %v202_v4 }
  0x3d   :  { %126 = vmatpush1.msra.mxu0 %v111_v8  ;;  %430 = vmatprep.subr.mxu1 %v249_v17  ;;  %v101_v24 = vld [vmem:[#allocation3 + $0x70] sm:$0xff]  ;;  %v247_v25 = vld [vmem:[#allocation8 + $0xe0] sm:$0xff]  ;;  %v246_v29 = vld [vmem:[#allocation8 + $0xd8] sm:$0xff] }
  0x3e   :  { %127 = vmatprep.subr.mxu0 %v110_v9  ;;  %431 = vmatpush3.msra.mxu1 %v233_v19  ;;  %v100_v26 = vld [vmem:[#allocation3 + $0x68] sm:$0xff]  ;;  %v99_v28 = vld [vmem:[#allocation3 + $0x60] sm:$0xff]  ;;  %v98_v30 = vld [vmem:[#allocation3 + $0x58] sm:$0xff]  ;;  %v601_v19 = vmov 0  }
  0x3f   :  { %128 = vmatpush1.msra.mxu0 %v109_v10  ;;  %432 = vmatprep.subr.mxu1 %v248_v21  ;;  %v231_v27 = vld [vmem:[#allocation8 + $0x60] sm:$0xff]  ;;  %v230_v31 = vld [vmem:[#allocation8 + $0x58] sm:$0xff]  ;;  %v97_v32 = vld [vmem:[#allocation3 + $0x50] sm:$0xff] }
  0x40   :  { %129 = vmatprep.subr.mxu0 %v108_v11  ;;  %433 = vmatpush3.msra.mxu1 %v232_v23  ;;  %v245_v33 = vld [vmem:[#allocation8 + $0xd0] sm:$0xff]  ;;  %v96_v34 = vld [vmem:[#allocation3 + $0x48] sm:$0xff]  ;;  %v95_v36 = vld [vmem:[#allocation3 + $0x40] sm:$0xff] }
  0x41   :  { %130 = vmatpush1.msra.mxu0 %v107_v12  ;;  %434 = vmatprep.subr.mxu1 %v247_v25  ;;  %v229_v35 = vld [vmem:[#allocation8 + $0x50] sm:$0xff]  ;;  %v244_v37 = vld [vmem:[#allocation8 + $0xc8] sm:$0xff]  ;;  %v243_v41 = vld [vmem:[#allocation8 + $0xc0] sm:$0xff] }
  0x42   :  { %131 = vmatprep.subr.mxu0 %v106_v13  ;;  %435 = vmatpush3.msra.mxu1 %v231_v27  ;;  %v94_v38 = vld [vmem:[#allocation3 + $0x38] sm:$0xff]  ;;  %v228_v39 = vld [vmem:[#allocation8 + $0x48] sm:$0xff]  ;;  %v227_v43 = vld [vmem:[#allocation8 + $0x40] sm:$0xff] }
  0x43   :  { %132 = vmatpush1.msra.mxu0 %v105_v14  ;;  %436 = vmatprep.subr.mxu1 %v246_v29  ;;  %v93_v40 = vld [vmem:[#allocation3 + $0x30] sm:$0xff]  ;;  %v92_v42 = vld [vmem:[#allocation3 + $0x28] sm:$0xff]  ;;  %v91_v44 = vld [vmem:[#allocation3 + $0x20] sm:$0xff] }
  0x44   :  { %133 = vmatprep.subr.mxu0 %v104_v18  ;;  %437 = vmatpush3.msra.mxu1 %v230_v31  ;;  %v242_v45 = vld [vmem:[#allocation8 + $0xb8] sm:$0xff]  ;;  %v89_v48 = vld [vmem:[#allocation3 + $0x10] sm:$0xff]  ;;  %v88_v50 = vld [vmem:[#allocation3 + $0x8] sm:$0xff] }
  0x45   :  { %134 = vmatpush1.msra.mxu0 %v103_v20  ;;  %438 = vmatprep.subr.mxu1 %v245_v33  ;;  %v90_v46 = vld [vmem:[#allocation3 + $0x18] sm:$0xff]  ;;  %v87_v52 = vld [vmem:[#allocation3] sm:$0xff]  ;;  %v240_v53 = vld [vmem:[#allocation8 + $0xa8] sm:$0xff] }
  0x46   :  { %135 = vmatprep.subr.mxu0 %v102_v22  ;;  %439 = vmatpush3.msra.mxu1 %v229_v35  ;;  %v226_v47 = vld [vmem:[#allocation8 + $0x38] sm:$0xff]  ;;  %v241_v49 = vld [vmem:[#allocation8 + $0xb0] sm:$0xff]  ;;  %v224_v55 = vld [vmem:[#allocation8 + $0x28] sm:$0xff] }
  0x47   :  { %136 = vmatpush1.msra.mxu0 %v101_v24  ;;  %440 = vmatprep.subr.mxu1 %v244_v37  ;;  %v225_v51 = vld [vmem:[#allocation8 + $0x30] sm:$0xff]  ;;  %v84_v54 = vld [vmem:[%s670_s0] sm:$0xff]  ;;  %v236_v62 = vld [vmem:[#allocation8 + $0x88] sm:$0xff] }
  0x48   :  { %137 = vmatprep.subr.mxu0 %v100_v26  ;;  %441 = vmatpush3.msra.mxu1 %v228_v39  ;;  %v239_v56 = vld [vmem:[#allocation8 + $0xa0] sm:$0xff]  ;;  %v238_v58 = vld [vmem:[#allocation8 + $0x98] sm:$0xff]  ;;  %v237_v60 = vld [vmem:[#allocation8 + $0x90] sm:$0xff] }
  0x49   :  { %138 = vmatpush1.msra.mxu0 %v99_v28  ;;  %442 = vmatprep.subr.mxu1 %v243_v41  ;;  %v223_v57 = vld [vmem:[#allocation8 + $0x20] sm:$0xff]  ;;  %v222_v59 = vld [vmem:[#allocation8 + $0x18] sm:$0xff]  ;;  %v221_v61 = vld [vmem:[#allocation8 + $0x10] sm:$0xff] }
  0x4a   :  { %139 = vmatprep.subr.mxu0 %v98_v30  ;;  %443 = vmatpush3.msra.mxu1 %v227_v43  ;;  %v220_v63 = vld [vmem:[#allocation8 + $0x8] sm:$0xff]  ;;  %v235_v1 = vld [vmem:[#allocation8 + $0x80] sm:$0xff]  ;;  %v199_v6 = vld [vmem:[#allocation6] sm:$0x3] }
  0x4b   :  { %140 = vmatpush1.msra.mxu0 %v97_v32  ;;  %444 = vmatprep.subr.mxu1 %v242_v45  ;;  %v219_v2 = vld [vmem:[#allocation8] sm:$0xff]  ;;  %v204_v8 = vrot.slane %v199_v6, %v203_v5  ;;  %v208_v9 = vrot.slane %v199_v6, %v207_v7 }
  0x4c   :  { %141 = vmatprep.subr.mxu0 %v96_v34  ;;  %445 = vmatpush3.msra.mxu1 %v226_v47  ;;  %v332_v18 = vld [vmem:[%s676_s6] sm:$0xff]  ;;  %s416_s6 = sshll.u32 %s602_s27, 4  ;;  %s417_s6 = int_to_ptr.vmem [resolvable:$true] %s416_s6 }
  0x4d   :  { %142 = vmatpush1.msra.mxu0 %v95_v36  ;;  %446 = vmatprep.subr.mxu1 %v241_v49  ;;  %v427_v21 = vld [vmem:[#allocation9] ss:$0 sm:$0xff]  ;;  %s563_s28 = scalar_lea.vmem %s417_s6, 128  ;;  %p568_p7 = scmp.lt.s32.totalorder %s417_s6, %s417_s6 }
  0x4e   :  { %143 = vmatprep.subr.mxu0 %v94_v38  ;;  %447 = vmatpush3.msra.mxu1 %v225_v51  ;;  %p564_p6 = scmp.ne.s32.totalorder %s417_s6, %s563_s28  ;;  %p569_p8 = scmp.lt.s32.totalorder %s563_s28, %s563_s28 }
  0x4f   :  { %144 = vmatpush1.msra.mxu0 %v93_v40  ;;  %448 = vmatprep.subr.mxu1 %v240_v53 }
  0x50   :  { %145 = vmatprep.subr.mxu0 %v92_v42  ;;  %449 = vmatpush3.msra.mxu1 %v224_v55  ;;  %p570_p9 = por %p569_p8, %p568_p7 }
  0x51   :  { %146 = vmatpush1.msra.mxu0 %v91_v44  ;;  %450 = vmatprep.subr.mxu1 %v239_v56 }
  0x52   :  { %147 = vmatprep.subr.mxu0 %v90_v46  ;;  %451 = vmatpush3.msra.mxu1 %v223_v57  ;;  %p571_p10 = pnand %p570_p9, %p564_p6 }
  0x53   :  { %148 = vmatpush1.msra.mxu0 %v89_v48  ;;  %452 = vmatprep.subr.mxu1 %v238_v58 }
  0x54   :  { %149 = vmatprep.subr.mxu0 %v88_v50  ;;  %453 = vmatpush3.msra.mxu1 %v222_v59 }
  0x55   :  { %150 = vmatpush1.msra.mxu0 %v87_v52  ;;  %454 = vmatprep.subr.mxu1 %v237_v60 }
  0x56   :  { %184 = vmatmul.mubr.f32.vlgmr.msra.gmra.mxu0 %v84_v54  ;;  %465 = vmatprep.subr.mxu0 %v599_v0 }
  0x57   :  { %455 = vmatpush3.msra.mxu1 %v221_v61  ;;  %467 = vmatprep.mubr.msk.f32.mxu0 %vm600_vm2, %v599_v0  ;;  %v331_v0 = vld [vmem:[%s675_s5] sm:$0xff] }
  0x58   :  { %456 = vmatprep.subr.mxu1 %v236_v62  ;;  %482 = vset.pattern.permute.xlu0 %v601_v19 }
  0x59   :  { %457 = vmatpush3.msra.mxu1 %v220_v63  ;;  %335 = vperm.xlu0 %482, %v332_v18  }
  0x5a   :  { %458 = vmatprep.subr.mxu1 %v235_v1 }
  0x5b   :  { %459 = vmatpush3.msra.mxu1 %v219_v2 }
  0xd4   :  { %v336_v27 = vpop.permute.xlu0 %335 }
 0x116   :  { %v185_v10 = vpop.f32.mrf.mxu0 }
 0x117   :  { %v211_v11 = vadd.f32 %v204_v8, %v185_v10 }
 0x118   :  { %v187_v12 = vpop.f32.mrf.mxu0 }
 0x119   :  { %v212_v13 = vadd.f32 %v208_v9, %v187_v12  ;;  %v215_v14 = vmul.f32 0.01, %v211_v11  ;;  %vm213_vm1 = vcmp.gt.f32.partialorder %v211_v11, 0.0 }
 0x11b   :  { %vm214_vm0 = vcmp.gt.f32.partialorder %v212_v13, 0.0  ;;  %v216_v15 = vmul.f32 0.01, %v212_v13  ;;  %v217_v17 = vsel %vm213_vm1, %v211_v11, %v215_v14 }
 0x11d   :  { %v218_v16 = vsel %vm214_vm0, %v212_v13, %v216_v15 }
 0x11e   :  { %322 = vmatprep.mubr.f32.mxu1 %v218_v16 }
 0x11f   :  { %323 = vmatmul.mubr.f32.vlgmr.msra.gmra.mxu1 %v217_v17 }
 0x1df   :  { %v460_v20 = vpop.f32.mrf.mxu1 }
 0x1e1   :  { %v461_v22 = vpop.f32.mrf.mxu1 }
 0x1e2   :  { %v462_v23 = vadd.f32 %v461_v22, %v460_v20 }
 0x1e4   :  { %v325_v24 = vadd.f32 %v462_v23, %v427_v21 }
 0x1e6   :  { %v329_v25 = vmul.f32 0.01, %v325_v24  ;;  %vm328_vm3 = vcmp.gt.f32.partialorder %v325_v24, 0.0 }
 0x1e8   :  { %v330_v26 = vsel %vm328_vm3, %v325_v24, %v329_v25 }
 0x1e9   :  { %466 = vmatpush3.xpose.msra.mxu0 %v330_v26 }
 0x1ec   :  { %468 = vmatmul.mubr.f32.vlgmr.msra.gmra.mxu0 %v331_v0 }
 0x2ac   :  { %v404_v28 = vpop.f32.mrf.mxu0 }
 0x2ad   :  { %v405_v29 = vadd.f32 %v404_v28, %v336_v27 }
 0x2ae   :  { %v469_v30 = vpop.f32.mrf.mxu0 }
 0x2af   :  { %409 = vst.msk [vmem:[#allocation11] sm:$0xff] %vm408_vm4, %v405_v29 }
 0x2b0   :  { %574 = shalt.err (!%p571_p10)
}
 0x2b1   :  { %419 = dma.vmem_to_hbm [thread:$0]  %s417_s6, 128, %s677_s7, [#allocation5]  }
 0x2b2   :  { %589 = dma.done.wait [#allocation5], 128  }
 0x2b3   :  { %590 = vsyncadd [#allocation5], 4294967168 }
 0x2b4   :  { %423 = vsyncpa [#allocation4], 1 }
 0x2b5   :  { %424 = vsyncpa [#allocation7], 1 }
 0x2b6   :  { %425 = vsyncpa [#allocation10], 1 }
 0x2b7   :  { %426 = vsyncpa [#allocation5], 1 }

</bundles_post_ra>
